<compile_context>
chip_gen: v7x
topology: tpu7x:2x2x1
jax: 0.10.0
libtpu: 0.0.40
codegen_flags: <defaults>
</compile_context>

<pallas_src>
import jax
import jax.numpy as jnp
from jax.experimental import pallas as pl
from jax.experimental.pallas import tpu as pltpu

LATENT_DIM = 32
HIDDEN_DIM = 400          # logical hidden size of the PyTorch module
HIDDEN_PAD = 512          # lane-aligned padded hidden size
OUTPUT_DIM = 256          # ctor arg in the PyTorch module; small lane-aligned choice
BN_EPS = 1e-5


def _round_up(x, m):
    return ((x + m - 1) // m) * m


# ----------------------------- fused decoder kernel -----------------------------

def decoder_kernel(z_ref, w1_ref, ss_ref, w2_ref, b2_ref, o_ref):
    """out = sigmoid(relu((z @ w1) * inv + shift) @ w2 + b2) for one batch tile.

    ss_ref is (2, HIDDEN_PAD) f32: row 0 = folded-BN scale, row 1 = folded-BN shift.
    """
    h = jnp.dot(z_ref[...].astype(w1_ref.dtype), w1_ref[...],
                preferred_element_type=jnp.float32)
    ss = ss_ref[...]
    h = jnp.maximum(h * ss[0:1, :] + ss[1:2, :], 0.0)            # folded BN + ReLU (f32 VPU)
    logits = jnp.dot(h.astype(w2_ref.dtype), w2_ref[...],
                     preferred_element_type=jnp.float32) + b2_ref[...]
    o_ref[...] = jax.nn.sigmoid(logits)


# ----------------------------- one-time parameter prep --------------------------

def prepare_params(w1, gamma, beta, w2, b2, *, mxu_dtype=jnp.bfloat16):
    """Pad the logical (400-wide) parameters to HIDDEN_PAD lanes and cast MXU operands.

    Done once at init / load time — NOT per forward call.
    """
    hp = HIDDEN_PAD - HIDDEN_DIM
    w1p = jnp.pad(w1, ((0, 0), (0, hp))).astype(mxu_dtype)       # zero cols: transparent
    w2p = jnp.pad(w2, ((0, hp), (0, 0))).astype(mxu_dtype)       # zero rows: transparent
    gammap = jnp.pad(gamma, ((0, 0), (0, hp)), constant_values=1.0)
    betap = jnp.pad(beta, ((0, 0), (0, hp)))
    b2f = b2.astype(jnp.float32)
    # f32 view of the (possibly bf16-quantized) fc1 weight the kernel actually uses,
    # so the Gram-identity batch statistics match the in-kernel h recompute.
    w1_stats = w1p.astype(jnp.float32)
    return dict(w1p=w1p, w2p=w2p, gammap=gammap, betap=betap, b2f=b2f, w1_stats=w1_stats)


# ----------------------------- forward wrapper -----------------------------------

def decoder_forward(z, params, *, tile_n=None):
    """z: (N, LATENT_DIM) f32.  params: output of prepare_params."""
    n = z.shape[0]
    if tile_n is None:
        tile_n = min(512, _round_up(max(n, 8), 8))               # adaptive batch tile
    n_pad = _round_up(max(n, tile_n), tile_n)
    num_tiles = n_pad // tile_n

    # ---- BatchNorm batch statistics via the Gram identity (tiny XLA math, f32) ----
    # h = z @ w1 (fc1 bias is cancelled by the BN mean subtraction), so
    #   sum_h = (sum z) @ w1,   E[h^2] = sum_axis0(w1 * ((z^T z) @ w1)) / N
    z32 = z.astype(jnp.float32)
    w1s = params["w1_stats"]                                     # (L, H) f32
    s = jnp.sum(z32, axis=0, keepdims=True)                      # (1, L)
    gram = z32.T @ z32                                           # (L, L)
    inv_n = 1.0 / jnp.float32(n)                                 # real batch size
    mean = (s @ w1s) * inv_n                                     # (1, H)
    e_h2 = jnp.sum(w1s * (gram @ w1s), axis=0, keepdims=True) * inv_n
    var = jnp.maximum(e_h2 - mean * mean, 0.0)                   # clamp: cancellation-safe
    inv = jax.lax.rsqrt(var + BN_EPS) * params["gammap"]
    shift = params["betap"] - mean * inv
    scale_shift = jnp.concatenate([inv, shift], axis=0)          # (2, H): packed resident operand

    # Padded batch rows produce garbage output rows that are sliced off below.
    zp = jnp.pad(z32, ((0, n_pad - n), (0, 0)))

    resident = lambda i: (0, 0)        # weights / folded-BN stay resident across batch tiles
    batch_tile = lambda i: (i, 0)

    out = pl.pallas_call(
        decoder_kernel,
        out_shape=jax.ShapeDtypeStruct((n_pad, OUTPUT_DIM), jnp.float32),
        grid=(num_tiles,),
        in_specs=[pl.BlockSpec((tile_n, LATENT_DIM), batch_tile),
                  pl.BlockSpec((LATENT_DIM, HIDDEN_PAD), resident),
                  pl.BlockSpec((2, HIDDEN_PAD), resident),
                  pl.BlockSpec((HIDDEN_PAD, OUTPUT_DIM), resident),
                  pl.BlockSpec((1, OUTPUT_DIM), resident)],
        out_specs=pl.BlockSpec((tile_n, OUTPUT_DIM), batch_tile),
        compiler_params=pltpu.CompilerParams(
            dimension_semantics=("parallel",)),                  # independent tiles -> megacore
    )(zp, params["w1p"], scale_shift, params["w2p"], params["b2f"])

    return out[:n]


# --------------------------------- reference + init ------------------------------

def init_params(key):
    """PyTorch nn.Linear-style init (U[-1/sqrt(fan_in), +]) at the *logical* sizes."""
    k1, k2, k3, k4 = jax.random.split(key, 4)
    lim1 = 1.0 / jnp.sqrt(jnp.float32(LATENT_DIM))
    lim2 = 1.0 / jnp.sqrt(jnp.float32(HIDDEN_DIM))
    w1 = jax.random.uniform(k1, (LATENT_DIM, HIDDEN_DIM), jnp.float32, -lim1, lim1)
    b1 = jax.random.uniform(k2, (1, HIDDEN_DIM), jnp.float32, -lim1, lim1)
    w2 = jax.random.uniform(k3, (HIDDEN_DIM, OUTPUT_DIM), jnp.float32, -lim2, lim2)
    b2 = jax.random.uniform(k4, (1, OUTPUT_DIM), jnp.float32, -lim2, lim2)
    gamma = jnp.ones((1, HIDDEN_DIM), jnp.float32)    # BatchNorm1d weight
    beta = jnp.zeros((1, HIDDEN_DIM), jnp.float32)    # BatchNorm1d bias
    return w1, b1, gamma, beta, w2, b2


def reference_forward(z, w1, b1, gamma, beta, w2, b2):
    """PyTorch-faithful forward (includes the fc1 bias; unpadded 400-dim hidden)."""
    h = z @ w1 + b1
    mean = jnp.mean(h, axis=0, keepdims=True)
    var = jnp.mean((h - mean) ** 2, axis=0, keepdims=True)       # biased var (training mode)
    h = (h - mean) * jax.lax.rsqrt(var + BN_EPS) * gamma + beta
    h = jnp.maximum(h, 0.0)
    return jax.nn.sigmoid(h @ w2 + b2)


if __name__ == "__main__":
    key = jax.random.PRNGKey(0)
    kz, kp = jax.random.split(key)
    # matches the script: z = torch.randn(10, latent_dim)
    z = jax.random.normal(kz, (10, LATENT_DIM), jnp.float32)
    w1, b1, gamma, beta, w2, b2 = init_params(kp)

    ref = reference_forward(z, w1, b1, gamma, beta, w2, b2)
    fwd = jax.jit(decoder_forward)

    # f32 MXU operands: tight numerical check against the PyTorch-faithful reference.
    params_f32 = prepare_params(w1, gamma, beta, w2, b2, mxu_dtype=jnp.float32)
    out_f32 = jax.block_until_ready(fwd(z, params_f32))
    assert out_f32.shape == (10, OUTPUT_DIM)
    assert jnp.allclose(out_f32, ref, atol=1e-4, rtol=1e-4), "f32 kernel mismatch vs reference"

    # bf16 MXU operands (default fast path on v5e/v6e/v7x): loosened tolerance vs f32 reference.
    params_bf16 = prepare_params(w1, gamma, beta, w2, b2)        # mxu_dtype=bf16 default
    out_bf16 = jax.block_until_ready(fwd(z, params_bf16))
    assert out_bf16.shape == (10, OUTPUT_DIM)
    assert jnp.allclose(out_bf16, ref, atol=3e-2, rtol=3e-2), "bf16 kernel mismatch vs reference"

    print("KERNEL_OK")
</pallas_src>

<mosaic_0001>
module attributes {stable_mosaic.version = 11 : i64} {
  func.func @decoder_kernel(%arg0: i32, %arg1: memref<16x32xf32, #tpu.memory_space<vmem>>, %arg2: memref<32x512xf32, #tpu.memory_space<vmem>>, %arg3: memref<2x512xf32, #tpu.memory_space<vmem>>, %arg4: memref<512x256xf32, #tpu.memory_space<vmem>>, %arg5: memref<1x256xf32, #tpu.memory_space<vmem>>, %arg6: memref<16x256xf32, #tpu.memory_space<vmem>>) attributes {dimension_semantics = [#tpu.dimension_semantics<parallel>], iteration_bounds = array<i64: 1>, scalar_prefetch = 0 : i64, scratch_operands = 0 : i64, tpu.core_type = #tpu.core_type<tc>, window_params = [{transform_indices = @transform_0, window_bounds = array<i64: 16, 32>}, {pipeline_mode = #tpu.pipeline_mode<synchronous>, transform_indices = @transform_1, window_bounds = array<i64: 32, 512>}, {pipeline_mode = #tpu.pipeline_mode<synchronous>, transform_indices = @transform_2, window_bounds = array<i64: 2, 512>}, {pipeline_mode = #tpu.pipeline_mode<synchronous>, transform_indices = @transform_3, window_bounds = array<i64: 512, 256>}, {pipeline_mode = #tpu.pipeline_mode<synchronous>, transform_indices = @transform_4, window_bounds = array<i64: 1, 256>}, {transform_indices = @transform_5, window_bounds = array<i64: 16, 256>}]} {
    %c0 = arith.constant 0 : index
    %c0_0 = arith.constant 0 : index
    %0 = vector.load %arg1[%c0, %c0_0] : memref<16x32xf32, #tpu.memory_space<vmem>>, vector<16x32xf32>
    %c0_1 = arith.constant 0 : index
    %c0_2 = arith.constant 0 : index
    %1 = vector.load %arg2[%c0_1, %c0_2] : memref<32x512xf32, #tpu.memory_space<vmem>>, vector<32x512xf32>
    %cst = arith.constant dense<0.000000e+00> : vector<16x512xf32>
    %2 = tpu.matmul %0, %1, %cst {dimension_numbers = #tpu.dot_dimension_numbers<[1], [0], [0], [1], [0, 0, 1, 1], [], []>} : vector<16x32xf32>, vector<32x512xf32>, vector<16x512xf32> -> vector<16x512xf32>
    %c0_3 = arith.constant 0 : index
    %c0_4 = arith.constant 0 : index
    %3 = vector.load %arg3[%c0_3, %c0_4] : memref<2x512xf32, #tpu.memory_space<vmem>>, vector<2x512xf32>
    %4 = vector.extract_strided_slice %3 {offsets = [0, 0], sizes = [1, 512], strides = [1, 1]} : vector<2x512xf32> to vector<1x512xf32>
    %5 = vector.broadcast %4 : vector<1x512xf32> to vector<16x512xf32>
    %6 = arith.mulf %2, %5 : vector<16x512xf32>
    %7 = vector.extract_strided_slice %3 {offsets = [1, 0], sizes = [1, 512], strides = [1, 1]} : vector<2x512xf32> to vector<1x512xf32>
    %8 = vector.broadcast %7 : vector<1x512xf32> to vector<16x512xf32>
    %9 = arith.addf %6, %8 : vector<16x512xf32>
    %cst_5 = arith.constant 0.000000e+00 : f32
    %10 = vector.broadcast %cst_5 : f32 to vector<16x512xf32>
    %11 = arith.maximumf %9, %10 : vector<16x512xf32>
    %c0_6 = arith.constant 0 : index
    %c0_7 = arith.constant 0 : index
    %12 = vector.load %arg4[%c0_6, %c0_7] : memref<512x256xf32, #tpu.memory_space<vmem>>, vector<512x256xf32>
    %cst_8 = arith.constant dense<0.000000e+00> : vector<16x256xf32>
    %13 = tpu.matmul %11, %12, %cst_8 {dimension_numbers = #tpu.dot_dimension_numbers<[1], [0], [0], [1], [0, 0, 1, 1], [], []>} : vector<16x512xf32>, vector<512x256xf32>, vector<16x256xf32> -> vector<16x256xf32>
    %c0_9 = arith.constant 0 : index
    %c0_10 = arith.constant 0 : index
    %14 = vector.load %arg5[%c0_9, %c0_10] : memref<1x256xf32, #tpu.memory_space<vmem>>, vector<1x256xf32>
    %15 = vector.broadcast %14 : vector<1x256xf32> to vector<16x256xf32>
    %16 = arith.addf %13, %15 : vector<16x256xf32>
    %17 = arith.negf %16 : vector<16x256xf32>
    %18 = math.exp %17 : vector<16x256xf32>
    %cst_11 = arith.constant 1.000000e+00 : f32
    %19 = vector.broadcast %cst_11 : f32 to vector<16x256xf32>
    %20 = arith.addf %19, %18 : vector<16x256xf32>
    %21 = arith.divf %19, %20 : vector<16x256xf32>
    %c0_12 = arith.constant 0 : index
    %c0_13 = arith.constant 0 : index
    %22 = vector.load %arg6[%c0_12, %c0_13] : memref<16x256xf32, #tpu.memory_space<vmem>>, vector<16x256xf32>
    tpu.vector_store %arg6[%c0_12, %c0_13], %21 {strides = array<i32>} : memref<16x256xf32, #tpu.memory_space<vmem>>, vector<16x256xf32>,
    return
  }
  func.func @transform_0(%arg0: i32) -> (i32, i32) {
    %c0_i32 = arith.constant 0 : i32
    %c0_i32_0 = arith.constant 0 : i32
    return %arg0, %c0_i32 : i32, i32
  }
  func.func @transform_1(%arg0: i32) -> (i32, i32) {
    %c0_i32 = arith.constant 0 : i32
    %c0_i32_0 = arith.constant 0 : i32
    %c0_i32_1 = arith.constant 0 : i32
    return %c0_i32, %c0_i32_0 : i32, i32
  }
  func.func @transform_2(%arg0: i32) -> (i32, i32) {
    %c0_i32 = arith.constant 0 : i32
    %c0_i32_0 = arith.constant 0 : i32
    %c0_i32_1 = arith.constant 0 : i32
    return %c0_i32, %c0_i32_0 : i32, i32
  }
  func.func @transform_3(%arg0: i32) -> (i32, i32) {
    %c0_i32 = arith.constant 0 : i32
    %c0_i32_0 = arith.constant 0 : i32
    %c0_i32_1 = arith.constant 0 : i32
    return %c0_i32, %c0_i32_0 : i32, i32
  }
  func.func @transform_4(%arg0: i32) -> (i32, i32) {
    %c0_i32 = arith.constant 0 : i32
    %c0_i32_0 = arith.constant 0 : i32
    %c0_i32_1 = arith.constant 0 : i32
    return %c0_i32, %c0_i32_0 : i32, i32
  }
  func.func @transform_5(%arg0: i32) -> (i32, i32) {
    %c0_i32 = arith.constant 0 : i32
    %c0_i32_0 = arith.constant 0 : i32
    return %arg0, %c0_i32 : i32, i32
  }
}

</mosaic_0001>

<bundles_post_ra>
// kernel: decoder_forward.1
= control target key start
LH: loop header
LB: loop body
LE: loop exit
PB: predicated region body
PF: predicated region fallthrough
CT: control target
= control target key end

     0   :  { %10 = vsyncpa [#allocation3], 0  ;;  %s1029_s0 = inlined_call_operand.vmem [shape: f32[16,32], index: 0, kind: input, shape index: {}]   ;;  %s1030_s1 = inlined_call_operand.vmem [shape: f32[32,512], index: 1, kind: input, shape index: {}]   ;;  %s1031_s2 = inlined_call_operand.vmem [shape: f32[2,512], index: 2, kind: input, shape index: {}]   ;;  %s1032_s3 = inlined_call_operand.hbm [shape: f32[512,256], index: 3, kind: input, shape index: {}]   ;;  %s1033_s4 = inlined_call_operand.vmem [shape: f32[1,256], index: 4, kind: input, shape index: {}]   ;;  %s1034_s5 = inlined_call_operand.hbm [shape: f32[16,256], index: 5, kind: output, shape index: {}]  }
   0x1   :  { %11 = vsyncpa [#allocation4], 0  ;;  %s880_s18 = smov [#allocation2]   ;;  %s832_s22 = scalar_lea.hbm %s1032_s3, 16384 }
   0x2   :  { %s23_s19 = sshll.u32 %s880_s18, 4  ;;  %p833_p0 = scmp.ne.s32.totalorder %s1032_s3, %s832_s22  ;;  %s24_s19 = int_to_ptr.vmem [resolvable:$true] %s23_s19 }
   0x3   :  { %p836_p1 = scmp.lt.u32.totalorder %s832_s22, %s1032_s3 }
   0x5   :  { %p838_p2 = pnand %p836_p1, %p833_p0 }
   0x7   :  { %841 = shalt.err (!%p838_p2)
}
   0x8   :  { %s842_s27 = scalar_lea.vmem %s24_s19, 16384  ;;  %p847_p4 = scmp.lt.s32.totalorder %s24_s19, %s24_s19 }
   0x9   :  { %p843_p3 = scmp.ne.s32.totalorder %s24_s19, %s842_s27  ;;  %p848_p5 = scmp.lt.s32.totalorder %s842_s27, %s842_s27 }
   0xb   :  { %p849_p6 = por %p848_p5, %p847_p4 }
   0xd   :  { %p850_p7 = pnand %p849_p6, %p843_p3 }
   0xf   :  { %853 = shalt.err (!%p850_p7)
}
  0x10   :  { %s881_s28 = smov 256   ;;  %s882_s29 = smov 16  }
  0x11   :  { %29 = dma.hbm_to_vmem [thread:$0]  %s1032_s3, 16384, %s24_s19, [#allocation3], %s881_s28, %s881_s28, %s882_s29  }
  0x12   :  { %876 = dma.done.wait [#allocation3], 16384  }
  0x13   :  { %877 = vsyncadd [#allocation3], 4294950912  ;;  %v883_v0 = vmov 0.0   ;;  %v38_v1 = vld [vmem:[%s1030_s1 + $0x8] sm:$0xff]  ;;  %v40_v3 = vld [vmem:[%s1030_s1 + $0x18] sm:$0xff]  ;;  %vm53_vm0 = vcmask 261120  }
  0x14   :  { %124 = vmatprep.mubr.f32.mxu0 %v883_v0  ;;  %201 = vmatprep.mubr.f32.mxu1 %v883_v0  ;;  %v42_v2 = vld [vmem:[%s1030_s1 + $0x28] sm:$0xff]  ;;  %v44_v5 = vld [vmem:[%s1030_s1 + $0x38] sm:$0xff]  ;;  %v37_v6 = vld [vmem:[%s1030_s1] sm:$0xff] }
  0x15   :  { %v659_v4 = vpack.c.bf16 %v42_v2, %v38_v1  ;;  %v41_v7 = vld [vmem:[%s1030_s1 + $0x20] sm:$0xff]  ;;  %v667_v8 = vpack.c.bf16 %v44_v5, %v40_v3  ;;  %v39_v10 = vld [vmem:[%s1030_s1 + $0x10] sm:$0xff]  ;;  %v46_v12 = vld [vmem:[%s1030_s1 + $0x48] sm:$0xff] }
  0x16   :  { %v661_v9 = vpack.c.bf16 %v41_v7, %v37_v6  ;;  %v43_v11 = vld [vmem:[%s1030_s1 + $0x30] sm:$0xff]  ;;  %v50_v14 = vld [vmem:[%s1030_s1 + $0x68] sm:$0xff]  ;;  %v48_v15 = vld [vmem:[%s1030_s1 + $0x58] sm:$0xff] }
  0x17   :  { %660 = vmatprep.subr.bf16.mxu0 %v659_v4  ;;  %v669_v13 = vpack.c.bf16 %v43_v11, %v39_v10  ;;  %v52_v16 = vld [vmem:[%s1030_s1 + $0x78] sm:$0xff]  ;;  %668 = vmatprep.subr.bf16.mxu1 %v667_v8  ;;  %v663_v17 = vpack.c.bf16 %v50_v14, %v46_v12  ;;  %v45_v19 = vld [vmem:[%s1030_s1 + $0x40] sm:$0xff]  ;;  %v47_v21 = vld [vmem:[%s1030_s1 + $0x50] sm:$0xff] }
  0x18   :  { %662 = vmatpush1.bf16.msra.mxu0 %v661_v9  ;;  %v671_v18 = vpack.c.bf16 %v52_v16, %v48_v15  ;;  %v49_v20 = vld [vmem:[%s1030_s1 + $0x60] sm:$0xff]  ;;  %v51_v23 = vld [vmem:[%s1030_s1 + $0x70] sm:$0xff]  ;;  %v313_v26 = vld [vmem:[#allocation2 + $0x8] sm:$0xff] }
  0x19   :  { %670 = vmatpush1.bf16.msra.mxu1 %v669_v13  ;;  %v665_v22 = vpack.c.bf16 %v49_v20, %v45_v19  ;;  %664 = vmatprep.subr.bf16.mxu0 %v663_v17  ;;  %v673_v24 = vpack.c.bf16 %v51_v23, %v47_v21  ;;  %v35_v25 = vld [vmem:[%s1029_s0] sm:$0xff]  ;;  %v315_v27 = vld [vmem:[#allocation2 + $0x18] sm:$0xff]  ;;  %v377_v28 = vld [vmem:[#allocation2 + $0x208] sm:$0xff] }
  0x1a   :  { %672 = vmatprep.subr.bf16.mxu1 %v671_v18  ;;  %v675_v29 = vpack.c.bf16 %v315_v27, %v313_v26  ;;  %v379_v30 = vld [vmem:[#allocation2 + $0x218] sm:$0xff]  ;;  %v312_v31 = vld [vmem:[#allocation2] sm:$0xff]  ;;  %v314_v32 = vld [vmem:[#allocation2 + $0x10] sm:$0xff] }
  0x1b   :  { %v739_v33 = vpack.c.bf16 %v379_v30, %v377_v28  ;;  %v376_v34 = vld [vmem:[#allocation2 + $0x200] sm:$0xff]  ;;  %v378_v35 = vld [vmem:[#allocation2 + $0x210] sm:$0xff]  ;;  %v317_v36 = vld [vmem:[#allocation2 + $0x28] sm:$0xff]  ;;  %v677_v37 = vpack.c.bf16 %v314_v32, %v312_v31 }
  0x1c   :  { %666 = vmatpush1.bf16.msra.mxu0 %v665_v22  ;;  %v319_v38 = vld [vmem:[#allocation2 + $0x38] sm:$0xff]  ;;  %v381_v39 = vld [vmem:[#allocation2 + $0x228] sm:$0xff]  ;;  %v741_v41 = vpack.c.bf16 %v378_v35, %v376_v34  ;;  %v316_v43 = vld [vmem:[#allocation2 + $0x20] sm:$0xff] }
  0x1d   :  { %674 = vmatpush1.bf16.msra.mxu1 %v673_v24  ;;  %v383_v40 = vld [vmem:[#allocation2 + $0x238] sm:$0xff]  ;;  %740 = vmatprep.subr.bf16.mxu0 %v739_v33  ;;  %v679_v42 = vpack.c.bf16 %v319_v38, %v317_v36  ;;  %v318_v44 = vld [vmem:[#allocation2 + $0x30] sm:$0xff]  ;;  %v380_v45 = vld [vmem:[#allocation2 + $0x220] sm:$0xff] }
  0x1e   :  { %676 = vmatprep.subr.bf16.mxu1 %v675_v29  ;;  %v743_v46 = vpack.c.bf16 %v383_v40, %v381_v39  ;;  %v382_v47 = vld [vmem:[#allocation2 + $0x230] sm:$0xff]  ;;  %v321_v48 = vld [vmem:[#allocation2 + $0x48] sm:$0xff]  ;;  %v323_v49 = vld [vmem:[#allocation2 + $0x58] sm:$0xff]  ;;  %v681_v53 = vpack.c.bf16 %v318_v44, %v316_v43 }
  0x1f   :  { %651 = vmatmul.mubr.msk.f32.vlgmr.msra.gmra.mrb[0].mxu0 %vm53_vm0, %v35_v25  ;;  %v36_v50 = vld [vmem:[%s1029_s0 + $0x8] sm:$0xff]  ;;  %v387_v52 = vld [vmem:[#allocation2 + $0x258] sm:$0xff]  ;;  %v745_v54 = vpack.c.bf16 %v382_v47, %v380_v45  ;;  %v683_v55 = vpack.c.bf16 %v323_v49, %v321_v48  ;;  %v320_v56 = vld [vmem:[#allocation2 + $0x40] sm:$0xff] }
  0x20   :  { %653 = vmatmul.mubr.msk.f32.vlgmr.msra.gmra.mrb[0].mxu1 %vm53_vm0, %v35_v25  ;;  %130 = vmatprep.mubr.f32.mxu0 %v883_v0  ;;  %v385_v51 = vld [vmem:[#allocation2 + $0x248] sm:$0xff]  ;;  %v322_v57 = vld [vmem:[#allocation2 + $0x50] sm:$0xff]  ;;  %v384_v58 = vld [vmem:[#allocation2 + $0x240] sm:$0xff] }
  0x21   :  { %207 = vmatprep.mubr.f32.mxu1 %v883_v0  ;;  %678 = vmatpush1.bf16.msra.mxu1 %v677_v37  ;;  %v747_v59 = vpack.c.bf16 %v387_v52, %v385_v51  ;;  %v386_v60 = vld [vmem:[#allocation2 + $0x250] sm:$0xff]  ;;  %v325_v61 = vld [vmem:[#allocation2 + $0x68] sm:$0xff]  ;;  %v327_v62 = vld [vmem:[#allocation2 + $0x78] sm:$0xff]  ;;  %v685_v1 = vpack.c.bf16 %v322_v57, %v320_v56 }
  0x22   :  { %742 = vmatpush1.bf16.msra.mxu0 %v741_v41  ;;  %680 = vmatprep.subr.bf16.mxu1 %v679_v42  ;;  %v389_v63 = vld [vmem:[#allocation2 + $0x268] sm:$0xff]  ;;  %v391_v0 = vld [vmem:[#allocation2 + $0x278] sm:$0xff]  ;;  %v749_v2 = vpack.c.bf16 %v386_v60, %v384_v58  ;;  %v687_v3 = vpack.c.bf16 %v327_v62, %v325_v61  ;;  %v324_v4 = vld [vmem:[#allocation2 + $0x60] sm:$0xff] }
  0x23   :  { %652 = vmatmul.mubr.msk.f32.gmra.mrb[2].mxu0 %vm53_vm0, %v36_v50  ;;  %744 = vmatprep.subr.bf16.mxu0 %v743_v46  ;;  %v326_v5 = vld [vmem:[#allocation2 + $0x70] sm:$0xff]  ;;  %v388_v6 = vld [vmem:[#allocation2 + $0x260] sm:$0xff]  ;;  %v751_v7 = vpack.c.bf16 %v391_v0, %v389_v63  ;;  %v329_v9 = vld [vmem:[#allocation2 + $0x88] sm:$0xff] }
  0x24   :  { %654 = vmatmul.mubr.msk.f32.gmra.mrb[2].mxu1 %vm53_vm0, %v36_v50  ;;  %v390_v8 = vld [vmem:[#allocation2 + $0x270] sm:$0xff]  ;;  %v331_v10 = vld [vmem:[#allocation2 + $0x98] sm:$0xff]  ;;  %v393_v11 = vld [vmem:[#allocation2 + $0x288] sm:$0xff]  ;;  %v689_v13 = vpack.c.bf16 %v326_v5, %v324_v4 }
  0x25   :  { %682 = vmatpush1.bf16.msra.mxu1 %v681_v53  ;;  %v395_v12 = vld [vmem:[#allocation2 + $0x298] sm:$0xff]  ;;  %v753_v14 = vpack.c.bf16 %v390_v8, %v388_v6  ;;  %v691_v15 = vpack.c.bf16 %v331_v10, %v329_v9  ;;  %v328_v16 = vld [vmem:[#allocation2 + $0x80] sm:$0xff]  ;;  %v330_v17 = vld [vmem:[#allocation2 + $0x90] sm:$0xff] }
  0x26   :  { %746 = vmatpush1.bf16.msra.mxu0 %v745_v54  ;;  %684 = vmatprep.subr.bf16.mxu1 %v683_v55  ;;  %v392_v18 = vld [vmem:[#allocation2 + $0x280] sm:$0xff]  ;;  %v755_v19 = vpack.c.bf16 %v395_v12, %v393_v11  ;;  %v394_v20 = vld [vmem:[#allocation2 + $0x290] sm:$0xff]  ;;  %v333_v21 = vld [vmem:[#allocation2 + $0xa8] sm:$0xff]  ;;  %v693_v25 = vpack.c.bf16 %v330_v17, %v328_v16 }
  0x27   :  { %748 = vmatprep.subr.bf16.mxu0 %v747_v59  ;;  %v335_v22 = vld [vmem:[#allocation2 + $0xb8] sm:$0xff]  ;;  %v397_v23 = vld [vmem:[#allocation2 + $0x2a8] sm:$0xff]  ;;  %v757_v26 = vpack.c.bf16 %v394_v20, %v392_v18  ;;  %v332_v28 = vld [vmem:[#allocation2 + $0xa0] sm:$0xff] }
  0x28   :  { %v399_v24 = vld [vmem:[#allocation2 + $0x2b8] sm:$0xff]  ;;  %v695_v27 = vpack.c.bf16 %v335_v22, %v333_v21  ;;  %v334_v29 = vld [vmem:[#allocation2 + $0xb0] sm:$0xff]  ;;  %v396_v30 = vld [vmem:[#allocation2 + $0x2a0] sm:$0xff] }
  0x29   :  { %686 = vmatpush1.bf16.msra.mxu1 %v685_v1  ;;  %v759_v31 = vpack.c.bf16 %v399_v24, %v397_v23  ;;  %v398_v32 = vld [vmem:[#allocation2 + $0x2b0] sm:$0xff]  ;;  %v337_v33 = vld [vmem:[#allocation2 + $0xc8] sm:$0xff]  ;;  %v339_v34 = vld [vmem:[#allocation2 + $0xd8] sm:$0xff]  ;;  %v697_v37 = vpack.c.bf16 %v334_v29, %v332_v28 }
  0x2a   :  { %750 = vmatpush1.bf16.msra.mxu0 %v749_v2  ;;  %688 = vmatprep.subr.bf16.mxu1 %v687_v3  ;;  %v401_v35 = vld [vmem:[#allocation2 + $0x2c8] sm:$0xff]  ;;  %v403_v36 = vld [vmem:[#allocation2 + $0x2d8] sm:$0xff]  ;;  %v761_v38 = vpack.c.bf16 %v398_v32, %v396_v30  ;;  %v699_v39 = vpack.c.bf16 %v339_v34, %v337_v33  ;;  %v336_v40 = vld [vmem:[#allocation2 + $0xc0] sm:$0xff] }
  0x2b   :  { %752 = vmatprep.subr.bf16.mxu0 %v751_v7  ;;  %v338_v41 = vld [vmem:[#allocation2 + $0xd0] sm:$0xff]  ;;  %v400_v42 = vld [vmem:[#allocation2 + $0x2c0] sm:$0xff]  ;;  %v763_v43 = vpack.c.bf16 %v403_v36, %v401_v35  ;;  %v341_v45 = vld [vmem:[#allocation2 + $0xe8] sm:$0xff] }
  0x2c   :  { %v402_v44 = vld [vmem:[#allocation2 + $0x2d0] sm:$0xff]  ;;  %v343_v46 = vld [vmem:[#allocation2 + $0xf8] sm:$0xff]  ;;  %v405_v47 = vld [vmem:[#allocation2 + $0x2e8] sm:$0xff]  ;;  %v701_v49 = vpack.c.bf16 %v338_v41, %v336_v40 }
  0x2d   :  { %690 = vmatpush1.bf16.msra.mxu1 %v689_v13  ;;  %v407_v48 = vld [vmem:[#allocation2 + $0x2f8] sm:$0xff]  ;;  %v765_v50 = vpack.c.bf16 %v402_v44, %v400_v42  ;;  %v703_v51 = vpack.c.bf16 %v343_v46, %v341_v45  ;;  %v340_v52 = vld [vmem:[#allocation2 + $0xe0] sm:$0xff]  ;;  %v342_v53 = vld [vmem:[#allocation2 + $0xf0] sm:$0xff] }
  0x2e   :  { %754 = vmatpush1.bf16.msra.mxu0 %v753_v14  ;;  %692 = vmatprep.subr.bf16.mxu1 %v691_v15  ;;  %v404_v54 = vld [vmem:[#allocation2 + $0x2e0] sm:$0xff]  ;;  %v767_v55 = vpack.c.bf16 %v407_v48, %v405_v47  ;;  %v406_v56 = vld [vmem:[#allocation2 + $0x2f0] sm:$0xff]  ;;  %v345_v57 = vld [vmem:[#allocation2 + $0x108] sm:$0xff]  ;;  %v705_v61 = vpack.c.bf16 %v342_v53, %v340_v52 }
  0x2f   :  { %756 = vmatprep.subr.bf16.mxu0 %v755_v19  ;;  %v347_v58 = vld [vmem:[#allocation2 + $0x118] sm:$0xff]  ;;  %v409_v59 = vld [vmem:[#allocation2 + $0x308] sm:$0xff]  ;;  %v769_v62 = vpack.c.bf16 %v406_v56, %v404_v54  ;;  %v344_v0 = vld [vmem:[#allocation2 + $0x100] sm:$0xff] }
  0x30   :  { %v411_v60 = vld [vmem:[#allocation2 + $0x318] sm:$0xff]  ;;  %v707_v63 = vpack.c.bf16 %v347_v58, %v345_v57  ;;  %v346_v1 = vld [vmem:[#allocation2 + $0x110] sm:$0xff]  ;;  %v408_v2 = vld [vmem:[#allocation2 + $0x300] sm:$0xff] }
  0x31   :  { %694 = vmatpush1.bf16.msra.mxu1 %v693_v25  ;;  %v771_v3 = vpack.c.bf16 %v411_v60, %v409_v59  ;;  %v410_v4 = vld [vmem:[#allocation2 + $0x310] sm:$0xff]  ;;  %v349_v5 = vld [vmem:[#allocation2 + $0x128] sm:$0xff]  ;;  %v351_v6 = vld [vmem:[#allocation2 + $0x138] sm:$0xff]  ;;  %v709_v9 = vpack.c.bf16 %v346_v1, %v344_v0 }
  0x32   :  { %758 = vmatpush1.bf16.msra.mxu0 %v757_v26  ;;  %696 = vmatprep.subr.bf16.mxu1 %v695_v27  ;;  %v413_v7 = vld [vmem:[#allocation2 + $0x328] sm:$0xff]  ;;  %v415_v8 = vld [vmem:[#allocation2 + $0x338] sm:$0xff]  ;;  %v773_v10 = vpack.c.bf16 %v410_v4, %v408_v2  ;;  %v711_v11 = vpack.c.bf16 %v351_v6, %v349_v5  ;;  %v348_v12 = vld [vmem:[#allocation2 + $0x120] sm:$0xff] }
  0x33   :  { %760 = vmatprep.subr.bf16.mxu0 %v759_v31  ;;  %v350_v13 = vld [vmem:[#allocation2 + $0x130] sm:$0xff]  ;;  %v412_v14 = vld [vmem:[#allocation2 + $0x320] sm:$0xff]  ;;  %v775_v15 = vpack.c.bf16 %v415_v8, %v413_v7  ;;  %v353_v17 = vld [vmem:[#allocation2 + $0x148] sm:$0xff] }
  0x34   :  { %v414_v16 = vld [vmem:[#allocation2 + $0x330] sm:$0xff]  ;;  %v355_v18 = vld [vmem:[#allocation2 + $0x158] sm:$0xff]  ;;  %v417_v19 = vld [vmem:[#allocation2 + $0x348] sm:$0xff]  ;;  %v713_v21 = vpack.c.bf16 %v350_v13, %v348_v12 }
  0x35   :  { %698 = vmatpush1.bf16.msra.mxu1 %v697_v37  ;;  %v419_v20 = vld [vmem:[#allocation2 + $0x358] sm:$0xff]  ;;  %v777_v22 = vpack.c.bf16 %v414_v16, %v412_v14  ;;  %v715_v23 = vpack.c.bf16 %v355_v18, %v353_v17  ;;  %v352_v24 = vld [vmem:[#allocation2 + $0x140] sm:$0xff]  ;;  %v354_v25 = vld [vmem:[#allocation2 + $0x150] sm:$0xff] }
  0x36   :  { %762 = vmatpush1.bf16.msra.mxu0 %v761_v38  ;;  %700 = vmatprep.subr.bf16.mxu1 %v699_v39  ;;  %v416_v26 = vld [vmem:[#allocation2 + $0x340] sm:$0xff]  ;;  %v779_v27 = vpack.c.bf16 %v419_v20, %v417_v19  ;;  %v418_v28 = vld [vmem:[#allocation2 + $0x350] sm:$0xff]  ;;  %v357_v29 = vld [vmem:[#allocation2 + $0x168] sm:$0xff]  ;;  %v717_v33 = vpack.c.bf16 %v354_v25, %v352_v24 }
  0x37   :  { %764 = vmatprep.subr.bf16.mxu0 %v763_v43  ;;  %v359_v30 = vld [vmem:[#allocation2 + $0x178] sm:$0xff]  ;;  %v421_v31 = vld [vmem:[#allocation2 + $0x368] sm:$0xff]  ;;  %v781_v34 = vpack.c.bf16 %v418_v28, %v416_v26  ;;  %v356_v36 = vld [vmem:[#allocation2 + $0x160] sm:$0xff] }
  0x38   :  { %v423_v32 = vld [vmem:[#allocation2 + $0x378] sm:$0xff]  ;;  %v719_v35 = vpack.c.bf16 %v359_v30, %v357_v29  ;;  %v358_v37 = vld [vmem:[#allocation2 + $0x170] sm:$0xff]  ;;  %v420_v38 = vld [vmem:[#allocation2 + $0x360] sm:$0xff] }
  0x39   :  { %702 = vmatpush1.bf16.msra.mxu1 %v701_v49  ;;  %v783_v39 = vpack.c.bf16 %v423_v32, %v421_v31  ;;  %v422_v40 = vld [vmem:[#allocation2 + $0x370] sm:$0xff]  ;;  %v361_v41 = vld [vmem:[#allocation2 + $0x188] sm:$0xff]  ;;  %v363_v42 = vld [vmem:[#allocation2 + $0x198] sm:$0xff]  ;;  %v721_v45 = vpack.c.bf16 %v358_v37, %v356_v36 }
  0x3a   :  { %766 = vmatpush1.bf16.msra.mxu0 %v765_v50  ;;  %704 = vmatprep.subr.bf16.mxu1 %v703_v51  ;;  %v425_v43 = vld [vmem:[#allocation2 + $0x388] sm:$0xff]  ;;  %v427_v44 = vld [vmem:[#allocation2 + $0x398] sm:$0xff]  ;;  %v785_v46 = vpack.c.bf16 %v422_v40, %v420_v38  ;;  %v723_v47 = vpack.c.bf16 %v363_v42, %v361_v41  ;;  %v360_v48 = vld [vmem:[#allocation2 + $0x180] sm:$0xff] }
  0x3b   :  { %768 = vmatprep.subr.bf16.mxu0 %v767_v55  ;;  %v362_v49 = vld [vmem:[#allocation2 + $0x190] sm:$0xff]  ;;  %v424_v50 = vld [vmem:[#allocation2 + $0x380] sm:$0xff]  ;;  %v787_v51 = vpack.c.bf16 %v427_v44, %v425_v43  ;;  %v365_v53 = vld [vmem:[#allocation2 + $0x1a8] sm:$0xff] }
  0x3c   :  { %v426_v52 = vld [vmem:[#allocation2 + $0x390] sm:$0xff]  ;;  %v367_v54 = vld [vmem:[#allocation2 + $0x1b8] sm:$0xff]  ;;  %v429_v55 = vld [vmem:[#allocation2 + $0x3a8] sm:$0xff]  ;;  %v725_v57 = vpack.c.bf16 %v362_v49, %v360_v48 }
  0x3d   :  { %706 = vmatpush1.bf16.msra.mxu1 %v705_v61  ;;  %v431_v56 = vld [vmem:[#allocation2 + $0x3b8] sm:$0xff]  ;;  %v789_v58 = vpack.c.bf16 %v426_v52, %v424_v50  ;;  %v727_v59 = vpack.c.bf16 %v367_v54, %v365_v53  ;;  %v364_v60 = vld [vmem:[#allocation2 + $0x1a0] sm:$0xff]  ;;  %v366_v61 = vld [vmem:[#allocation2 + $0x1b0] sm:$0xff] }
  0x3e   :  { %770 = vmatpush1.bf16.msra.mxu0 %v769_v62  ;;  %708 = vmatprep.subr.bf16.mxu1 %v707_v63  ;;  %v791_v62 = vpack.c.bf16 %v431_v56, %v429_v55  ;;  %v428_v63 = vld [vmem:[#allocation2 + $0x3a0] sm:$0xff]  ;;  %v430_v0 = vld [vmem:[#allocation2 + $0x3b0] sm:$0xff]  ;;  %v729_v1 = vpack.c.bf16 %v366_v61, %v364_v60  ;;  %v371_v4 = vld [vmem:[#allocation2 + $0x1d8] sm:$0xff] }
  0x3f   :  { %772 = vmatprep.subr.bf16.mxu0 %v771_v3  ;;  %v793_v2 = vpack.c.bf16 %v430_v0, %v428_v63  ;;  %v369_v3 = vld [vmem:[#allocation2 + $0x1c8] sm:$0xff]  ;;  %v435_v6 = vld [vmem:[#allocation2 + $0x3d8] sm:$0xff]  ;;  %v368_v7 = vld [vmem:[#allocation2 + $0x1c0] sm:$0xff] }
  0x40   :  { %v433_v5 = vld [vmem:[#allocation2 + $0x3c8] sm:$0xff]  ;;  %v370_v8 = vld [vmem:[#allocation2 + $0x1d0] sm:$0xff]  ;;  %v439_v19 = vld [vmem:[#allocation2 + $0x3f8] sm:$0xff] }
  0x41   :  { %710 = vmatpush1.bf16.msra.mxu1 %v709_v9  ;;  %v432_v9 = vld [vmem:[#allocation2 + $0x3c0] sm:$0xff]  ;;  %v795_v12 = vpack.c.bf16 %v435_v6, %v433_v5  ;;  %v733_v13 = vpack.c.bf16 %v370_v8, %v368_v7  ;;  %v373_v14 = vld [vmem:[#allocation2 + $0x1e8] sm:$0xff]  ;;  %v438_v25 = vld [vmem:[#allocation2 + $0x3f0] sm:$0xff] }
  0x42   :  { %774 = vmatpush1.bf16.msra.mxu0 %v773_v10  ;;  %712 = vmatprep.subr.bf16.mxu1 %v711_v11  ;;  %v434_v10 = vld [vmem:[#allocation2 + $0x3d0] sm:$0xff]  ;;  %v731_v11 = vpack.c.bf16 %v371_v4, %v369_v3  ;;  %v437_v16 = vld [vmem:[#allocation2 + $0x3e8] sm:$0xff]  ;;  %v372_v20 = vld [vmem:[#allocation2 + $0x1e0] sm:$0xff] }
  0x43   :  { %776 = vmatprep.subr.bf16.mxu0 %v775_v15  ;;  %v375_v15 = vld [vmem:[#allocation2 + $0x1f8] sm:$0xff]  ;;  %v797_v17 = vpack.c.bf16 %v434_v10, %v432_v9  ;;  %v436_v24 = vld [vmem:[#allocation2 + $0x3e0] sm:$0xff] }
  0x44   :  { %v735_v18 = vpack.c.bf16 %v375_v15, %v373_v14  ;;  %v801_v26 = vpack.c.bf16 %v438_v25, %v436_v24  ;;  %v214_v30 = vld [vmem:[%s1031_s2] sm:$0xff] }
  0x45   :  { %714 = vmatpush1.bf16.msra.mxu1 %v713_v21  ;;  %v374_v21 = vld [vmem:[#allocation2 + $0x1f0] sm:$0xff] }
  0x46   :  { %778 = vmatpush1.bf16.msra.mxu0 %v777_v22  ;;  %716 = vmatprep.subr.bf16.mxu1 %v715_v23  ;;  %v799_v22 = vpack.c.bf16 %v439_v19, %v437_v16  ;;  %v737_v23 = vpack.c.bf16 %v374_v21, %v372_v20 }
  0x47   :  { %780 = vmatprep.subr.bf16.mxu0 %v779_v27  ;;  %v216_v27 = vlaneseq }
  0x49   :  { %718 = vmatpush1.bf16.msra.mxu1 %v717_v33  ;;  %v217_v28 = vshrl.u32 %v216_v27, 7 }
  0x4a   :  { %782 = vmatpush1.bf16.msra.mxu0 %v781_v34  ;;  %720 = vmatprep.subr.bf16.mxu1 %v719_v35 }
  0x4b   :  { %784 = vmatprep.subr.bf16.mxu0 %v783_v39  ;;  %v992_v29 = vsub.s32 0, %v217_v28  ;;  %v226_v31 = vsub.s32 4, %v217_v28  ;;  %v222_v32 = vsub.s32 2, %v217_v28  ;;  %v997_v33 = vsub.s32 1, %v217_v28 }
  0x4c   :  { %v230_v34 = vsub.s32 6, %v217_v28  ;;  %v270_v35 = vsub.s32 5, %v217_v28  ;;  %v266_v36 = vsub.s32 3, %v217_v28  ;;  %v274_v38 = vsub.s32 7, %v217_v28 }
  0x4d   :  { %722 = vmatpush1.bf16.msra.mxu1 %v721_v45  ;;  %v219_v37 = vrot.slane %v214_v30, %v992_v29  ;;  %v227_v39 = vrot.slane %v214_v30, %v226_v31  ;;  %v223_v40 = vrot.slane %v214_v30, %v222_v32  ;;  %v263_v41 = vrot.slane %v214_v30, %v997_v33 }
  0x4e   :  { %786 = vmatpush1.bf16.msra.mxu0 %v785_v46  ;;  %724 = vmatprep.subr.bf16.mxu1 %v723_v47  ;;  %v231_v42 = vrot.slane %v214_v30, %v230_v34  ;;  %v271_v43 = vrot.slane %v214_v30, %v270_v35  ;;  %v267_v44 = vrot.slane %v214_v30, %v266_v36 }
  0x4f   :  { %788 = vmatprep.subr.bf16.mxu0 %v787_v51  ;;  %v239_v45 = vrot.slane %v219_v37, %v992_v29  ;;  %v275_v46 = vrot.slane %v214_v30, %v274_v38  ;;  %v247_v47 = vrot.slane %v227_v39, %v992_v29  ;;  %v243_v48 = vrot.slane %v223_v40, %v992_v29 }
  0x50   :  { %v283_v49 = vrot.slane %v263_v41, %v997_v33  ;;  %v251_v50 = vrot.slane %v231_v42, %v992_v29  ;;  %v291_v52 = vrot.slane %v271_v43, %v997_v33  ;;  %v287_v53 = vrot.slane %v267_v44, %v997_v33 }
  0x51   :  { %726 = vmatpush1.bf16.msra.mxu1 %v725_v57  ;;  %v295_v57 = vrot.slane %v275_v46, %v997_v33 }
  0x52   :  { %790 = vmatpush1.bf16.msra.mxu0 %v789_v58  ;;  %728 = vmatprep.subr.bf16.mxu1 %v727_v59 }
  0x53   :  { %792 = vmatprep.subr.bf16.mxu0 %v791_v62 }
  0x55   :  { %730 = vmatpush1.bf16.msra.mxu1 %v729_v1 }
  0x56   :  { %794 = vmatpush1.bf16.msra.mxu0 %v793_v2  ;;  %732 = vmatprep.subr.bf16.mxu1 %v731_v11 }
  0x57   :  { %796 = vmatprep.subr.bf16.mxu0 %v795_v12 }
  0x59   :  { %734 = vmatpush1.bf16.msra.mxu1 %v733_v13 }
  0x5a   :  { %798 = vmatpush1.bf16.msra.mxu0 %v797_v17  ;;  %736 = vmatprep.subr.bf16.mxu1 %v735_v18 }
  0x5b   :  { %800 = vmatprep.subr.bf16.mxu0 %v799_v22  ;;  %v440_v22 = vld [vmem:[%s1033_s4] sm:$0x3]  ;;  %s884_s4 = smov [#allocation5]  }
  0x5c   :  { %v449_v24 = vrot.slane %v440_v22, %v997_v33  ;;  %s639_s19 = sshll.u32 %s884_s4, 4  ;;  %s640_s19 = int_to_ptr.vmem [resolvable:$true] %s639_s19 }
  0x5d   :  { %738 = vmatpush1.bf16.msra.mxu1 %v737_v23  ;;  %v445_v23 = vrot.slane %v440_v22, %v992_v29  ;;  %s854_s20 = scalar_lea.vmem %s640_s19, 512  ;;  %p859_p9 = scmp.lt.s32.totalorder %s640_s19, %s640_s19 }
  0x5e   :  { %802 = vmatpush1.bf16.msra.mxu0 %v801_v26  ;;  %p855_p8 = scmp.ne.s32.totalorder %s640_s19, %s854_s20  ;;  %p860_p10 = scmp.lt.s32.totalorder %s854_s20, %s854_s20 }
  0x60   :  { %p861_p11 = por %p860_p10, %p859_p9 }
  0x62   :  { %p862_p12 = pnand %p861_p11, %p855_p8 }
  0xf2   :  { %v126_v51 = vpop.f32.mrb[0].mxu0 }
  0xf3   :  { %v252_v54 = vmul.f32 %v239_v45, %v126_v51  ;;  %v203_v55 = vpop.f32.mrb[0].mxu1  ;;  %v128_v56 = vpop.f32.mrb[1].mxu0 }
  0xf4   :  { %v254_v58 = vmul.f32 %v247_v47, %v203_v55  ;;  %v253_v59 = vmul.f32 %v243_v48, %v128_v56  ;;  %v205_v60 = vpop.f32.mrb[1].mxu1 }
  0xf5   :  { %v296_v61 = vadd.f32 %v283_v49, %v252_v54  ;;  %v255_v62 = vmul.f32 %v251_v50, %v205_v60 }
  0xf6   :  { %v298_v63 = vadd.f32 %v291_v52, %v254_v58  ;;  %v297_v0 = vadd.f32 %v287_v53, %v253_v59  ;;  %v132_v1 = vpop.f32.mrb[2].mxu0 }
  0xf7   :  { %v299_v2 = vadd.f32 %v295_v57, %v255_v62  ;;  %v256_v3 = vmul.f32 %v239_v45, %v132_v1  ;;  %v209_v4 = vpop.f32.mrb[2].mxu1  ;;  %v134_v5 = vpop.f32.mrb[3].mxu0  ;;  %v304_v11 = vmax.f32 %v296_v61, 0.0 }
  0xf8   :  { %v306_v6 = vmax.f32 %v298_v63, 0.0  ;;  %v305_v7 = vmax.f32 %v297_v0, 0.0  ;;  %v258_v8 = vmul.f32 %v247_v47, %v209_v4  ;;  %v257_v9 = vmul.f32 %v243_v48, %v134_v5  ;;  %v211_v10 = vpop.f32.mrb[3].mxu1 }
  0xf9   :  { %v307_v12 = vmax.f32 %v299_v2, 0.0  ;;  %v300_v13 = vadd.f32 %v283_v49, %v256_v3  ;;  %v259_v14 = vmul.f32 %v251_v50, %v211_v10 }
  0xfa   :  { %v302_v15 = vadd.f32 %v291_v52, %v258_v8  ;;  %v301_v16 = vadd.f32 %v287_v53, %v257_v9  ;;  %516 = vmatprep.mubr.f32.mxu1 %v305_v7 }
  0xfb   :  { %v303_v17 = vadd.f32 %v295_v57, %v259_v14  ;;  %593 = vmatprep.mubr.f32.mxu0 %v307_v12  ;;  %517 = vmatmul.mubr.f32.vlgmr.msra.gmra.mrb[4].mxu1 %v304_v11  ;;  %v308_v20 = vmax.f32 %v300_v13, 0.0 }
  0xfc   :  { %v310_v18 = vmax.f32 %v302_v15, 0.0  ;;  %v309_v19 = vmax.f32 %v301_v16, 0.0  ;;  %594 = vmatmul.mubr.f32.vlgmr.msra.gmra.mrb[4].mxu0 %v306_v6 }
  0xfd   :  { %v311_v21 = vmax.f32 %v303_v17, 0.0 }
  0xfe   :  { %522 = vmatprep.mubr.f32.mxu1 %v309_v19 }
  0xff   :  { %599 = vmatprep.mubr.f32.mxu0 %v311_v21  ;;  %523 = vmatmul.mubr.f32.gmra.mrb[6].mxu1 %v308_v20 }
 0x100   :  { %600 = vmatmul.mubr.f32.gmra.mrb[6].mxu0 %v310_v18 }
 0x1ce   :  { %v518_v25 = vpop.f32.mrb[4].mxu1 }
 0x1cf   :  { %v519_v26 = vadd.f32 %v518_v25, %v445_v23  ;;  %v595_v27 = vpop.f32.mrb[4].mxu0  ;;  %v520_v28 = vpop.f32.mrb[5].mxu1 }
 0x1d0   :  { %v521_v30 = vadd.f32 %v520_v28, %v449_v24  ;;  %v597_v31 = vpop.f32.mrb[5].mxu0 }
 0x1d1   :  { %v596_v32 = vadd.f32 %v595_v27, %v519_v26 }
 0x1d2   :  { %v598_v34 = vadd.f32 %v597_v31, %v521_v30  ;;  %v524_v35 = vpop.f32.mrb[6].mxu1 }
 0x1d3   :  { %v655_v36 = vmul.f32 -1.442695, %v596_v32  ;;  %v525_v37 = vadd.f32 %v524_v35, %v445_v23  ;;  %v601_v38 = vpop.f32.mrb[6].mxu0  ;;  %v526_v39 = vpop.f32.mrb[7].mxu1 }
 0x1d4   :  { %v656_v40 = vmul.f32 -1.442695, %v598_v34  ;;  %v527_v41 = vadd.f32 %v526_v39, %v449_v24  ;;  %v603_v42 = vpop.f32.mrb[7].mxu0 }
 0x1d5   :  { %816 = vpow2.f32 %v655_v36  ;;  %v602_v29 = vadd.f32 %v601_v38, %v525_v37 }
 0x1d6   :  { %818 = vpow2.f32 %v656_v40  ;;  %v604_v33 = vadd.f32 %v603_v42, %v527_v41 }
 0x1d7   :  { %v657_v43 = vmul.f32 -1.442695, %v602_v29 }
 0x1d8   :  { %v658_v44 = vmul.f32 -1.442695, %v604_v33 }
 0x1d9   :  { %820 = vpow2.f32 %v657_v43 }
 0x1da   :  { %822 = vpow2.f32 %v658_v44 }
 0x1df   :  { %v817_v45 = vpop.eup %816 }
 0x1e0   :  { %v819_v46 = vpop.eup %818  ;;  %v618_v47 = vadd.f32 1.0, %v817_v45 }
 0x1e1   :  { %v619_v48 = vadd.f32 1.0, %v819_v46 }
 0x1e2   :  { %824 = vrcp.f32 %v618_v47 }
 0x1e3   :  { %v821_v49 = vpop.eup %820  ;;  %826 = vrcp.f32 %v619_v48 }
 0x1e4   :  { %v823_v50 = vpop.eup %822  ;;  %v620_v51 = vadd.f32 1.0, %v821_v49 }
 0x1e5   :  { %v621_v52 = vadd.f32 1.0, %v823_v50 }
 0x1e6   :  { %828 = vrcp.f32 %v620_v51 }
 0x1e7   :  { %830 = vrcp.f32 %v621_v52 }
 0x1ec   :  { %v825_v53 = vpop.eup %824 }
 0x1ed   :  { %v827_v54 = vpop.eup %826  ;;  %630 = vst [vmem:[#allocation5] sm:$0xff] %v825_v53 }
 0x1ee   :  { %631 = vst [vmem:[#allocation5 + $0x8] sm:$0xff] %v827_v54 }
 0x1f0   :  { %v829_v55 = vpop.eup %828 }
 0x1f1   :  { %v831_v56 = vpop.eup %830  ;;  %632 = vst [vmem:[#allocation5 + $0x10] sm:$0xff] %v829_v55 }
 0x1f2   :  { %633 = vst [vmem:[#allocation5 + $0x18] sm:$0xff] %v831_v56 }
 0x1f3   :  { %865 = shalt.err (!%p862_p12)
}
 0x1f4   :  { %s866_s23 = scalar_lea.hbm %s1034_s5, 512 }
 0x1f5   :  { %p867_p13 = scmp.ne.s32.totalorder %s1034_s5, %s866_s23  ;;  %p870_p0 = scmp.lt.u32.totalorder %s866_s23, %s1034_s5 }
 0x1f7   :  { %p872_p1 = pnand %p870_p0, %p867_p13 }
 0x1f9   :  { %875 = shalt.err (!%p872_p1)
}
 0x1fa   :  { %645 = dma.vmem_to_hbm [thread:$0]  %s640_s19, 512, %s1034_s5, [#allocation4], %s881_s28, %s881_s28, %s882_s29  }
 0x1fb   :  { %878 = dma.done.wait [#allocation4], 512  }
 0x1fc   :  { %879 = vsyncadd [#allocation4], 4294966784 }
 0x1fd   :  { %649 = vsyncpa [#allocation3], 1 }
 0x1fe   :  { %650 = vsyncpa [#allocation4], 1 }

</bundles_post_ra>
